<compile_context>
chip_gen: v7x
topology: tpu7x:2x2x1
jax: 0.10.0
libtpu: 0.0.40
codegen_flags: <defaults>
</compile_context>

<pallas_src>
import functools

import jax
import jax.numpy as jnp
from jax import lax
from jax.experimental import pallas as pl
from jax.experimental.pallas import tpu as pltpu


# -----------------------------------------------------------------------------
# Kernel: 2 MXU matmuls + a handful of VPU/XLU ops, one dense output store.
# -----------------------------------------------------------------------------
def graphnet_kernel(n, xm_ref, m_ref, w_ref, out_ref):
    # xm_ref : (8, 48)  lanes 0:32 = [m_tgt@x16 | m_src@x16], lane 32 = d,
    #                    lane 40 = dc (= d*c_bias + bo, row7 = bc),
    #                    lane 41 = wc (clf weight column, row7 = 1).
    # m_ref  : (16, 8)  rows 0:8 = m_tgt (zero padded), rows 8:16 = m_src.
    # w_ref  : (48, 128) rows 0:32 folded FirstGraphNet weights, row 32 = b1,
    #                    row 33 = wa, row 34 = wb, rows 35:48 = 0.

    # ---- FirstGraphNet (all linears + bias folded into one matmul) ----
    # d*b1 comes from lane 32 hitting weight row 32; lanes 40/41 hit zero rows.
    first = jnp.dot(xm_ref[...], w_ref[...],
                    preferred_element_type=jnp.float32)          # (8, 128)

    # ---- FinalGraphNet: both mean-operator applications in one matmul ----
    proj2 = jnp.dot(m_ref[...], first,
                    preferred_element_type=jnp.float32)          # (16, 128)
    wa = w_ref[33:34, :]                                          # (1, 128)
    wb = w_ref[34:35, :]                                          # (1, 128)
    proj = proj2[0:8] * wa + proj2[8:16] * wb                     # (8, 128)

    dc = xm_ref[:, 40:41]                                         # (8, 1)
    wc = xm_ref[:, 41:42]                                         # (8, 1)
    final8 = jnp.sum(proj, axis=-1, keepdims=True) + dc           # (8, 1)

    # ---- Net.clf on reshape(final, (1, n)); bc folded via row 7 ----
    clf = jnp.sum(final8 * wc)                                    # scalar

    # ---- single lane-dense (8,128) store: rows 0..n-1 = final, row n = clf ----
    row_ids = lax.broadcasted_iota(jnp.int32, (8, 128), 0)
    out_ref[...] = jnp.where(row_ids == n, clf, final8)


# -----------------------------------------------------------------------------
# Parameter init (deterministic, matches the PyTorch module's linear shapes).
# Weights stored transposed (in_features, out_features): math is x @ W + b.
# -----------------------------------------------------------------------------
def init_params(key):
    def linear(key, fan_in, fan_out):
        k1, k2 = jax.random.split(key)
        bound = 1.0 / jnp.sqrt(jnp.float32(fan_in))
        w = jax.random.uniform(k1, (fan_in, fan_out), jnp.float32, -bound, bound)
        b = jax.random.uniform(k2, (1, fan_out), jnp.float32, -bound, bound)
        return w, b

    keys = jax.random.split(key, 10)
    p = {}
    # FirstGraphNet
    p['wx'], p['bx'] = linear(keys[0], 2, 64)
    p['wy'], p['by'] = linear(keys[1], 2, 64)
    p['wth'], p['bth'] = linear(keys[2], 4, 64)
    p['wv'], p['bv'] = linear(keys[3], 192, 64)
    p['we1'], p['be1'] = linear(keys[4], 132, 128)   # cat(x_i, x_j, col_i, col_j)
    # FinalGraphNet
    p['wx2'], p['bx2'] = linear(keys[5], 128, 64)
    p['we2'], p['be2'] = linear(keys[6], 128, 64)    # cat(x_i, x_j)
    p['wo'], p['bo'] = linear(keys[7], 64, 1)
    # Net.clf (in_features = n_nodes = 3)
    p['wc'], p['bc'] = linear(keys[8], 3, 1)
    return p


# -----------------------------------------------------------------------------
# One-time, parameter-only folding (hoisted out of the per-call path).
# -----------------------------------------------------------------------------
def fold_params(p):
    f32 = jnp.float32

    # ---- FirstGraphNet: blockdiag(wx,wy,wth) @ wv, then @ edge_lin ----
    wv = p['wv']
    w_fused = jnp.concatenate([p['wx'] @ wv[0:64],
                               p['wy'] @ wv[64:128],
                               p['wth'] @ wv[128:192]], axis=0)          # (8,64)
    b_fused = (p['bx'] @ wv[0:64] + p['by'] @ wv[64:128]
               + p['bth'] @ wv[128:192] + p['bv'])                       # (1,64)

    we1 = p['we1']
    we1_xi, we1_xj = we1[0:64], we1[64:128]
    we1_ci, we1_cj = we1[128:130], we1[130:132]
    w_tgt16 = jnp.zeros((16, 128), f32)
    w_tgt16 = w_tgt16.at[0:8].set(w_fused @ we1_xi).at[8:10].set(we1_ci)
    w_src16 = jnp.zeros((16, 128), f32)
    w_src16 = w_src16.at[0:8].set(w_fused @ we1_xj).at[8:10].set(we1_cj)
    # Per-edge bias folded onto nodes (weighted by d via the kernel's lane-32 col).
    b1 = b_fused @ we1_xi + b_fused @ we1_xj + p['be1']                  # (1,128)

    # ---- FinalGraphNet: x_lin @ edge_lin @ output_lin ----
    we2_xi, we2_xj = p['we2'][0:64], p['we2'][64:128]
    wa = (p['wx2'] @ we2_xi @ p['wo']).T                                 # (1,128)
    wb = (p['wx2'] @ we2_xj @ p['wo']).T                                 # (1,128)
    c_bias = ((p['bx2'] @ we2_xi + p['bx2'] @ we2_xj + p['be2'])
              @ p['wo'])[0, 0]                                           # scalar

    # ---- (48,128) weight slab: one DMA for all dense params ----
    w_slab = jnp.zeros((48, 128), f32)
    w_slab = w_slab.at[0:16].set(w_tgt16)      # folded layer-1 weights (tgt path)
    w_slab = w_slab.at[16:32].set(w_src16)     # folded layer-1 weights (src path)
    w_slab = w_slab.at[32].set(b1[0])          # layer-1 bias row (hit by d lane)
    w_slab = w_slab.at[33].set(wa[0])          # layer-2 folded vector (tgt path)
    w_slab = w_slab.at[34].set(wb[0])          # layer-2 folded vector (src path)
    # rows 35:48 stay zero (incl. rows 40/41 facing the dc/wc data lanes)

    return {'w_slab': w_slab, 'c_bias': c_bias,
            'bo': p['bo'][0, 0], 'bc': p['bc'][0, 0], 'wc': p['wc']}


# -----------------------------------------------------------------------------
# Per-forward (data-dependent) slab construction + fused kernel call.
# -----------------------------------------------------------------------------
def _build_data_slabs(x, edge_index, fp):
    """x: (N,10), edge_index: (2,E).  Returns ((8,48) slab, (16,8) m_stack)."""
    f32 = jnp.float32
    n = x.shape[0]
    src, tgt = edge_index[0], edge_index[1]   # flow='source_to_target': j=src, i=tgt

    # Mean message-passing operators; E never enters the kernel.
    g_src = jax.nn.one_hot(src, n, dtype=f32)                 # (E,N)
    g_tgt = jax.nn.one_hot(tgt, n, dtype=f32)                 # (E,N)
    counts = jnp.maximum(jnp.sum(g_tgt, axis=0), 1.0)
    aggr = g_tgt.T / counts[:, None]                          # (N,E) mean scatter
    m_tgt = aggr @ g_tgt                                      # (N,N)
    m_src = aggr @ g_src                                      # (N,N)
    d = jnp.sum(aggr, axis=1)                                 # (N,): 1 if deg>0 else 0

    x16 = jnp.pad(x.astype(f32), ((0, 0), (0, 6)))            # (N,16)
    xm = jnp.concatenate([m_tgt @ x16, m_src @ x16], axis=1)  # (N,32)
    dc = d * fp['c_bias'] + fp['bo']                          # (N,)

    slab = jnp.zeros((8, 48), f32)
    slab = slab.at[0:n, 0:32].set(xm)
    slab = slab.at[0:n, 32].set(d)            # d column -> hits bias row 32
    slab = slab.at[0:n, 40].set(dc)           # final-stage per-node bias
    slab = slab.at[0:n, 41].set(fp['wc'][:, 0])  # clf weight column
    slab = slab.at[7, 40].set(fp['bc'])       # clf bias folded into padded row 7
    slab = slab.at[7, 41].set(1.0)

    m_stack = jnp.zeros((16, 8), f32)
    m_stack = m_stack.at[0:n, 0:n].set(m_tgt)
    m_stack = m_stack.at[8:8 + n, 0:n].set(m_src)
    return slab, m_stack


def net_forward(x, edge_index, folded):
    """x: (N,10) float32, edge_index: (2,E) int32, folded = fold_params(p)."""
    n = x.shape[0]
    assert 1 <= n <= 7, "fused kernel assumes N <= 7 (module hard-codes N=3)"

    slab, m_stack = _build_data_slabs(x, edge_index, folded)
    w_slab = folded['w_slab']

    flops = 2 * (8 * 48 * 128) + 2 * (16 * 8 * 128) + 5 * 8 * 128
    bytes_accessed = 4 * (slab.size + m_stack.size + w_slab.size + 8 * 128)

    out = pl.pallas_call(
        functools.partial(graphnet_kernel, n),
        out_shape=jax.ShapeDtypeStruct((8, 128), jnp.float32),
        in_specs=[
            pl.BlockSpec(memory_space=pltpu.MemorySpace.VMEM),   # (8,48)  data slab
            pl.BlockSpec(memory_space=pltpu.MemorySpace.VMEM),   # (16,8)  m_stack
            pl.BlockSpec(memory_space=pltpu.MemorySpace.VMEM),   # (48,128) weights
        ],
        out_specs=pl.BlockSpec(memory_space=pltpu.MemorySpace.VMEM),
        cost_estimate=pl.CostEstimate(flops=flops, transcendentals=0,
                                      bytes_accessed=bytes_accessed),
    )(slab, m_stack, w_slab)

    final = out[0:n, 0:1]          # (N,1)
    clf = out[n:n + 1, 0:1]        # (1,1)
    return final, clf


# -----------------------------------------------------------------------------
# Pure-JAX reference mirroring the PyTorch MessagePassing semantics.
# -----------------------------------------------------------------------------
def reference_forward(x, edge_index, p):
    src, tgt = edge_index[0], edge_index[1]
    n = x.shape[0]

    def mean_aggr(msg, tgt, n):
        s = jax.ops.segment_sum(msg, tgt, num_segments=n)
        c = jax.ops.segment_sum(jnp.ones((msg.shape[0],), jnp.float32), tgt,
                                num_segments=n)
        return s / jnp.maximum(c, 1.0)[:, None]

    # FirstGraphNet
    x_val = x[:, 0:2] @ p['wx'] + p['bx']
    y_val = x[:, 2:4] @ p['wy'] + p['by']
    th_val = x[:, 4:8] @ p['wth'] + p['bth']
    f = jnp.concatenate([x_val, y_val, th_val], -1) @ p['wv'] + p['bv']
    col = x[:, 8:10]
    ein1 = jnp.concatenate([f[tgt], f[src], col[tgt], col[src]], -1)
    msg1 = ein1 @ p['we1'] + p['be1']
    first = mean_aggr(msg1, tgt, n)
    # FinalGraphNet
    xv = first @ p['wx2'] + p['bx2']
    ein2 = jnp.concatenate([xv[tgt], xv[src]], -1)
    msg2 = ein2 @ p['we2'] + p['be2']
    final = mean_aggr(msg2, tgt, n) @ p['wo'] + p['bo']
    clf = final.reshape(1, n) @ p['wc'] + p['bc']
    return final, clf


if __name__ == "__main__":
    key = jax.random.PRNGKey(0)
    k_x, k_p = jax.random.split(key)

    # Mirrors the script: edge_idx fixed, x = randn(3, 10)
    edge_index = jnp.array([[0, 1, 1, 2], [1, 0, 2, 1]], dtype=jnp.int32)
    x = jax.random.normal(k_x, (3, 10), dtype=jnp.float32)
    params = init_params(k_p)

    # Parameter-only folding: once, outside the per-call path.
    folded = fold_params(params)
    folded = jax.tree_util.tree_map(jax.block_until_ready, folded)

    fwd = jax.jit(net_forward)
    final_out, clf_out = fwd(x, edge_index, folded)
    jax.block_until_ready((final_out, clf_out))

    ref_final, ref_clf = reference_forward(x, edge_index, params)
    assert jnp.allclose(final_out, ref_final, rtol=1e-4, atol=1e-4)
    assert jnp.allclose(clf_out, ref_clf, rtol=1e-4, atol=1e-4)

    print("KERNEL_OK")
</pallas_src>

<mosaic_0001>
module attributes {stable_mosaic.version = 11 : i64} {
  func.func @graphnet_kernel(%arg0: memref<8x48xf32, #tpu.memory_space<vmem>>, %arg1: memref<16x8xf32, #tpu.memory_space<vmem>>, %arg2: memref<48x128xf32, #tpu.memory_space<vmem>>, %arg3: memref<8x128xf32, #tpu.memory_space<vmem>>) attributes {dimension_semantics = [], scalar_prefetch = 0 : i64, scratch_operands = 0 : i64, tpu.core_type = #tpu.core_type<tc>} {
    %c0 = arith.constant 0 : index
    %c0_0 = arith.constant 0 : index
    %0 = vector.load %arg0[%c0, %c0_0] : memref<8x48xf32, #tpu.memory_space<vmem>>, vector<8x48xf32>
    %c0_1 = arith.constant 0 : index
    %c0_2 = arith.constant 0 : index
    %1 = vector.load %arg2[%c0_1, %c0_2] : memref<48x128xf32, #tpu.memory_space<vmem>>, vector<48x128xf32>
    %cst = arith.constant dense<0.000000e+00> : vector<8x128xf32>
    %2 = tpu.matmul %0, %1, %cst {dimension_numbers = #tpu.dot_dimension_numbers<[1], [0], [0], [1], [0, 0, 1, 1], [], []>} : vector<8x48xf32>, vector<48x128xf32>, vector<8x128xf32> -> vector<8x128xf32>
    %c0_3 = arith.constant 0 : index
    %c0_4 = arith.constant 0 : index
    %3 = vector.load %arg1[%c0_3, %c0_4] : memref<16x8xf32, #tpu.memory_space<vmem>>, vector<16x8xf32>
    %cst_5 = arith.constant dense<0.000000e+00> : vector<16x128xf32>
    %4 = tpu.matmul %3, %2, %cst_5 {dimension_numbers = #tpu.dot_dimension_numbers<[1], [0], [0], [1], [0, 0, 1, 1], [], []>} : vector<16x8xf32>, vector<8x128xf32>, vector<16x128xf32> -> vector<16x128xf32>
    %c33 = arith.constant 33 : index
    %c0_6 = arith.constant 0 : index
    %5 = vector.load %arg2[%c33, %c0_6] : memref<48x128xf32, #tpu.memory_space<vmem>>, vector<1x128xf32>
    %c34 = arith.constant 34 : index
    %c0_7 = arith.constant 0 : index
    %6 = vector.load %arg2[%c34, %c0_7] : memref<48x128xf32, #tpu.memory_space<vmem>>, vector<1x128xf32>
    %7 = vector.extract_strided_slice %4 {offsets = [0, 0], sizes = [8, 128], strides = [1, 1]} : vector<16x128xf32> to vector<8x128xf32>
    %8 = vector.broadcast %5 : vector<1x128xf32> to vector<8x128xf32>
    %9 = arith.mulf %7, %8 : vector<8x128xf32>
    %10 = vector.extract_strided_slice %4 {offsets = [8, 0], sizes = [8, 128], strides = [1, 1]} : vector<16x128xf32> to vector<8x128xf32>
    %11 = vector.broadcast %6 : vector<1x128xf32> to vector<8x128xf32>
    %12 = arith.mulf %10, %11 : vector<8x128xf32>
    %13 = arith.addf %9, %12 : vector<8x128xf32>
    %c0_8 = arith.constant 0 : index
    %c40 = arith.constant 40 : index
    %14 = vector.load %arg0[%c0_8, %c40] : memref<8x48xf32, #tpu.memory_space<vmem>>, vector<8x1xf32>
    %c0_9 = arith.constant 0 : index
    %c41 = arith.constant 41 : index
    %15 = vector.load %arg0[%c0_9, %c41] : memref<8x48xf32, #tpu.memory_space<vmem>>, vector<8x1xf32>
    %cst_10 = arith.constant dense<0.000000e+00> : vector<8xf32>
    %16 = vector.multi_reduction <add>, %13, %cst_10 [1] : vector<8x128xf32> to vector<8xf32>
    %17 = vector.shape_cast %16 : vector<8xf32> to vector<8x1xf32>
    %18 = arith.addf %17, %14 : vector<8x1xf32>
    %19 = arith.mulf %18, %15 : vector<8x1xf32>
    %20 = vector.shape_cast %19 : vector<8x1xf32> to vector<1x8x1xf32>
    %cst_11 = arith.constant dense<0.000000e+00> : vector<1xf32>
    %21 = vector.multi_reduction <add>, %20, %cst_11 [1, 2] : vector<1x8x1xf32> to vector<1xf32>
    %22 = vector.shape_cast %21 : vector<1xf32> to vector<1x1x1xf32>
    %23 = vector.extract %22[0, 0, 0] : f32 from vector<1x1x1xf32>
    %24 = tpu.iota {dimensions = array<i32: 0>} : vector<8x128xi32>
    %c3_i32 = arith.constant 3 : i32
    %25 = vector.broadcast %c3_i32 : i32 to vector<8x128xi32>
    %26 = arith.cmpi eq, %24, %25 : vector<8x128xi32>
    %27 = vector.broadcast %23 : f32 to vector<8x128xf32>
    %28 = vector.shape_cast %18 : vector<8x1xf32> to vector<8x1xf32>
    %29 = vector.broadcast %28 : vector<8x1xf32> to vector<8x128xf32>
    %30 = arith.select %26, %27, %29 : vector<8x128xi1>, vector<8x128xf32>
    %c0_12 = arith.constant 0 : index
    %c0_13 = arith.constant 0 : index
    %31 = vector.load %arg3[%c0_12, %c0_13] : memref<8x128xf32, #tpu.memory_space<vmem>>, vector<8x128xf32>
    tpu.vector_store %arg3[%c0_12, %c0_13], %30 {strides = array<i32>} : memref<8x128xf32, #tpu.memory_space<vmem>>, vector<8x128xf32>,
    return
  }
}

</mosaic_0001>

<bundles_post_ra>
// kernel: net_forward.1
= control target key start
LH: loop header
LB: loop body
LE: loop exit
PB: predicated region body
PF: predicated region fallthrough
CT: control target
= control target key end

     0   :  { %v282_v0 = vmov 0.0|0.0   ;;  %vm283_vm0 = vmmov 0   ;;  %v284_v4 = vmov 0.0   ;;  %vm21_vm1 = vcmask 392192   ;;  %s287_s6 = smov 88   ;;  %s344_s2 = inlined_call_operand.vmem [shape: f32[48,128], index: 2, kind: input, shape index: {}]   ;;  %s345_s0 = inlined_call_operand.vmem [shape: f32[8,48], index: 0, kind: input, shape index: {}]   ;;  %s346_s1 = inlined_call_operand.vmem [shape: f32[16,8], index: 1, kind: input, shape index: {}]   ;;  %s347_s3 = inlined_call_operand.vmem [shape: f32[8,128], index: 3, kind: output, shape index: {}]  }
   0x1   :  { %264 = vmatprep.subr.bf16.mxu0 %v282_v0  ;;  %v15_v1 = vld [vmem:[%s344_s2] sm:$0xff]  ;;  %v16_v2 = vld [vmem:[%s344_s2 + $0x8] sm:$0xff]  ;;  %v17_v3 = vld [vmem:[%s344_s2 + $0x10] sm:$0xff]  ;;  %256 = vmatprep.mubr.msk.f32.mxu0 %vm283_vm0, %v284_v4  ;;  %vm97_vm2 = vcmask 64512   ;;  %v285_v23 = vmov 40   ;;  %vm203_vm3 = vcmask 7168   ;;  %v214_v37 = vlaneseq }
   0x2   :  { %v265_v5 = vpack.c.bf16 %v16_v2, %v15_v1  ;;  %v18_v6 = vld [vmem:[%s344_s2 + $0x18] sm:$0xff]  ;;  %v19_v8 = vld [vmem:[%s344_s2 + $0x20] sm:$0xff]  ;;  %v20_v9 = vld [vmem:[%s344_s2 + $0x28] sm:$0xff]  ;;  %281 = vset.pattern.permute.xlu0 %v285_v23 }
   0x3   :  { %v268_v7 = vpack.c.bf16 %v18_v6, %v17_v3  ;;  %v271_v10 = vpack.c.bf16 %v20_v9, %v19_v8  ;;  %v14_v11 = vld [vmem:[%s345_s0] sm:$0xff]  ;;  %v96_v14 = vld [vmem:[%s346_s1 + $0x8] sm:$0xff]  ;;  %v215_v38 = vshrl.u32 %v214_v37, 7 }
   0x4   :  { %266 = vmatpush3.bf16.msra.mxu0 %v265_v5  ;;  %v95_v12 = vld [vmem:[%s346_s1] sm:$0xff]  ;;  %s286_s1 = smov 127  }
   0x5   :  { %267 = vmatprep.subr.bf16.mxu0 %v282_v0  ;;  %261 = vmatprep.mubr.msk.f32.mxu1 %vm97_vm2, %v95_v12  ;;  %v233_v16 = vld [vmem:[%s344_s2 + $0x22] ss:$0 sm:$0xff]  ;;  %v232_v17 = vld [vmem:[%s344_s2 + $0x21] ss:$0 sm:$0xff]  ;;  %vm216_vm4 = vcmp.eq.s32.totalorder %v215_v38, 3 }
   0x8   :  { %269 = vmatpush3.bf16.msra.mxu0 %v268_v7 }
   0x9   :  { %270 = vmatprep.subr.bf16.mxu0 %v282_v0 }
   0xc   :  { %272 = vmatpush3.bf16.msra.mxu0 %v271_v10 }
   0xf   :  { %257 = vmatmul.mubr.msk.f32.vlgmr.msra.gmra.mrb[0].mxu0 %vm21_vm1, %v14_v11 }
  0xe2   :  { %v91_v13 = vpop.f32.mrb[0].mxu0 }
  0xe3   :  { %v258_v15 = vpop.f32.mrb[1].mxu0  ;;  %259 = vmatprep.subr.mxu1 %v91_v13 }
  0xe4   :  { %260 = vmatpush3.msra.mxu1 %v91_v13 }
  0xe5   :  { %262 = vmatmul.mubr.msk.f32.vlgmr.msra.gmra.mrb[0].mxu1 %vm97_vm2, %v96_v14 }
 0x1b8   :  { %v263_v18 = vpop.f32.mrb[0].mxu1 }
 0x1b9   :  { %v190_v19 = vmul.f32 %v263_v18, %v233_v16  ;;  %v170_v20 = vpop.f32.mrb[1].mxu1 }
 0x1ba   :  { %v185_v21 = vmul.f32 %v232_v17, %v170_v20 }
 0x1bc   :  { %v191_v22 = vadd.f32 %v190_v19, %v185_v21 }
 0x1be   :  { %192 = vadd.xlane.f32.xlu0 %v191_v22 }
 0x1d4   :  { %195 = vrot.lane.b32.xlu0 %v14_v11, %s286_s1 }
 0x24b   :  { %v193_v24 = vpop.xlane.xlu0 %192 }
 0x24c   :  { %v194_v25 = vadd.f32 %v193_v24, %v14_v11 }
 0x24e   :  { %220 = vperm.xlu0 %281, %v194_v25  }
 0x24f   :  { %v196_v26 = vpop.permute.xlu0 %195 }
 0x250   :  { %v198_v27 = vmul.f32 %v196_v26, %v194_v25 }
 0x252   :  { %200 = vrot.lane.b32.xlu1 %v198_v27, %s287_s6 }
 0x2c4   :  { %v201_v28 = vpop.permute.xlu1 %200 }
 0x2c5   :  { %v204_v29 = vsel %vm203_vm3, %v201_v28, 0.0 }
 0x2c6   :  { %205 = vadd.xlane.f32.xlu1 %v204_v29 }
 0x2cd   :  { %v221_v39 = vpop.permute.xlu0 %220 }
 0x353   :  { %v206_v30 = vpop.xlane.xlu1 %205 }
 0x354   :  { %v207_v31 = vrot.slane %v206_v30, 4 }
 0x356   :  { %v208_v32 = vadd.f32 %v207_v31, %v206_v30 }
 0x358   :  { %v209_v33 = vrot.slane %v208_v32, 2 }
 0x35a   :  { %v210_v34 = vadd.f32 %v209_v33, %v208_v32 }
 0x35c   :  { %v211_v35 = vrot.slane %v210_v34, 1 }
 0x35e   :  { %v212_v36 = vadd.f32 %v211_v35, %v210_v34 }
 0x360   :  { %273 = vpush %v212_v36 }
 0x391   :  { %s274_s2 = spop %273 }
 0x392   :  { %v217_v40 = vstv %s274_s2 }
 0x393   :  { %v223_v41 = vsel %vm216_vm4, %v217_v40, %v221_v39 }
 0x394   :  { %224 = vst [vmem:[%s347_s3] sm:$0xff] %v223_v41 }

</bundles_post_ra>
